<compile_context>
chip_gen: v7x
topology: tpu7x:2x2x1
jax: 0.10.0
libtpu: 0.0.40
codegen_flags: <defaults>
</compile_context>

<pallas_src>
import jax
import jax.numpy as jnp
from jax import lax
from jax.experimental import pallas as pl
from jax.experimental.pallas import tpu as pltpu


def _round_up(x, m):
    return ((x + m - 1) // m) * m


def _pick_tile(s, cap=256):
    """Query-point tile TS: S % TS == 0 and TS % 8 == 0 (or TS == S)."""
    if s <= cap:
        return s
    for ts in range(cap, 7, -1):
        if s % ts == 0 and ts % 8 == 0:
            return ts
    return s


# ----------------------------------------------------------------------------
# Pallas kernel: in-kernel knn gather fused with layer 1, rest of MLP, max over K
# ----------------------------------------------------------------------------
def _make_td_kernel(num_rest, k_neighbors, ts, n_points):
    def kernel(*refs):
        idx_ref, fproj_ref, corr_ref = refs[0], refs[1], refs[2]
        w_refs = refs[3:3 + num_rest]                       # (Cp_{l-1}, Cp_l) bf16
        b_refs = refs[3 + num_rest:3 + 2 * num_rest]        # (1, Cp_l) f32
        out_ref = refs[3 + 2 * num_rest]                    # (1, TS, Cp_last)

        idx = idx_ref[0]          # (K, TS, 1) int32 knn indices (neighbor-major)
        fproj = fproj_ref[0]      # (N, C1p)   bf16  per-batch  feat @ W1
        corr = corr_ref[0]        # (TS, C1p)  f32   per-query  b1 - center @ W1

        # One-hot gather fused with the first conv layer: onehot @ (feat @ W1).
        iota_n = lax.broadcasted_iota(jnp.int32, (k_neighbors, ts, n_points), 2)
        onehot = (idx == iota_n).astype(jnp.bfloat16)            # (K, TS, N)
        onehot = onehot.reshape(k_neighbors * ts, n_points)      # k-major row blocks
        h = jnp.dot(onehot, fproj, preferred_element_type=jnp.float32)  # (K*TS, C1p)

        c1p = h.shape[-1]
        h = h.reshape(k_neighbors, ts, c1p)
        h = jnp.maximum(h + corr[None, :, :], 0.0)               # layer-1 bias/center + ReLU
        h = h.reshape(k_neighbors * ts, c1p)

        # Remaining 1x1 conv (+folded BN) + ReLU layers: bf16 MXU, f32 accumulate.
        for w_ref, b_ref in zip(w_refs, b_refs):
            h = jnp.dot(h.astype(jnp.bfloat16), w_ref[...],
                        preferred_element_type=jnp.float32)
            h = jnp.maximum(h + b_ref[...], 0.0)

        # Max over the K neighbor row blocks (elementwise VPU max across slices).
        h = h.reshape(k_neighbors, ts, h.shape[-1])
        out_ref[0] = jnp.max(h, axis=0).astype(out_ref.dtype)

    return kernel


def sa_mlp_pallas(idx_t, feat_proj, corr, rest_w, rest_b, *, tile_s=None):
    """Fused knn-grouping + shared-MLP + neighbor-max.

    idx_t:     (B, K, S, 1) int32 knn indices (neighbor-major layout).
    feat_proj: (B, N, C1p) bf16  = [xyz | feats | 0-pad] @ W1_pad   (layer-1 fused in).
    corr:      (B, S, C1p) f32   = b1_pad - new_xyz @ W1_pad[:3].
    rest_w:    list of (Cp_{l-1}, Cp_l) bf16 (layers 2..L, BN folded, zero padded).
    rest_b:    list of (1, Cp_l) f32.
    Returns (B, S, Cp_last) f32 (padded channels are zero).
    """
    B, K, S, _ = idx_t.shape
    _, N, C1p = feat_proj.shape
    Cout = rest_w[-1].shape[1] if rest_w else C1p
    num_rest = len(rest_w)
    TS = tile_s if tile_s is not None else _pick_tile(S)
    assert S % TS == 0 and TS % 8 == 0, "npoint tile must be a multiple of 8 dividing S"

    in_specs = [
        pl.BlockSpec((1, K, TS, 1), lambda b, j: (b, 0, j, 0)),   # knn indices
        pl.BlockSpec((1, N, C1p), lambda b, j: (b, 0, 0)),        # projected point table (resident per batch)
        pl.BlockSpec((1, TS, C1p), lambda b, j: (b, j, 0)),       # per-query layer-1 correction
    ]
    for w in rest_w:
        in_specs.append(pl.BlockSpec(w.shape, lambda b, j: (0, 0)))
    for bb in rest_b:
        in_specs.append(pl.BlockSpec(bb.shape, lambda b, j: (0, 0)))
    out_spec = pl.BlockSpec((1, TS, Cout), lambda b, j: (b, j, 0))  # lane-dense (Cout % 128 == 0)

    kernel = _make_td_kernel(num_rest, K, TS, N)
    return pl.pallas_call(
        kernel,
        out_shape=jax.ShapeDtypeStruct((B, S, Cout), jnp.float32),
        grid_spec=pltpu.PrefetchScalarGridSpec(
            num_scalar_prefetch=0,
            grid=(B, S // TS),
            in_specs=in_specs,
            out_specs=out_spec,
        ),
        compiler_params=pltpu.CompilerParams(
            dimension_semantics=("parallel", "parallel"),
            vmem_limit_bytes=48 * 1024 * 1024,   # safe on v7x (64 MiB/TC), above v5e/v6e defaults
        ),
    )(idx_t, feat_proj, corr, *rest_w, *rest_b)


# ----------------------------------------------------------------------------
# Plain-JAX glue: farthest point sampling, knn, gathers
# ----------------------------------------------------------------------------
def farthest_point_sample(xyz, npoint):
    # TODO(synk): PyTorch seeds FPS with torch.randint; we start at index 0 for determinism.
    B, N, _ = xyz.shape

    def body(i, state):
        distance, farthest, centroids = state
        centroids = centroids.at[:, i].set(farthest)
        centroid = jnp.take_along_axis(xyz, farthest[:, None, None], axis=1)  # (B,1,3)
        dist = jnp.sum((xyz - centroid) ** 2, axis=-1)                        # (B,N)
        distance = jnp.minimum(distance, dist)
        farthest = jnp.argmax(distance, axis=-1).astype(jnp.int32)
        return distance, farthest, centroids

    distance = jnp.full((B, N), 1e10, dtype=xyz.dtype)
    farthest = jnp.zeros((B,), dtype=jnp.int32)
    centroids = jnp.zeros((B, npoint), dtype=jnp.int32)
    _, _, centroids = jax.lax.fori_loop(0, npoint, body,
                                        (distance, farthest, centroids))
    return centroids


def square_distance(src, dst):
    d = -2.0 * jnp.einsum('bsc,bnc->bsn', src, dst)
    d = d + jnp.sum(src ** 2, axis=-1)[..., None]
    d = d + jnp.sum(dst ** 2, axis=-1)[:, None, :]
    return d


def index_points(points, idx):
    B = points.shape[0]
    batch_idx = jnp.arange(B).reshape((B,) + (1,) * (idx.ndim - 1))
    return points[batch_idx, idx]


# ----------------------------------------------------------------------------
# TransitionDown module (parameters initialized deterministically in-script)
# ----------------------------------------------------------------------------
class TransitionDownPallas:
    def __init__(self, k, nneighbor, channels, key):
        self.npoint = k
        self.nsample = nneighbor
        self.channels = list(channels)
        # Conv2d(last, out, kernel=1) + BatchNorm2d(out) + ReLU.
        # TODO(synk): BatchNorm is folded in eval mode (running stats mean=0, var=1,
        # gamma=1, beta=0); training-mode batch statistics are not reproduced.
        eps = 1e-5
        bn_scale = 1.0 / jnp.sqrt(1.0 + eps)
        self.weights, self.biases = [], []
        last = channels[0]
        for out_c in channels[1:]:
            key, kw, kb = jax.random.split(key, 3)
            w = jax.random.normal(kw, (last, out_c), jnp.float32) / jnp.sqrt(float(last))
            b = 0.01 * jax.random.normal(kb, (1, out_c), jnp.float32)
            self.weights.append(w * bn_scale)     # BN scale folded into weight
            self.biases.append(b * bn_scale)      # BN shift folded into bias
            last = out_c
        # Lane-dense (128-padded) kernel parameters: bf16 weights, f32 biases.
        self.w_pad, self.b_pad = [], []
        cin_p = _round_up(channels[0], 128)
        for w, b in zip(self.weights, self.biases):
            cout_p = _round_up(w.shape[1], 128)
            wp = jnp.zeros((cin_p, cout_p), jnp.float32)
            wp = wp.at[:w.shape[0], :w.shape[1]].set(w)
            bp = jnp.zeros((1, cout_p), jnp.float32).at[:, :b.shape[1]].set(b)
            self.w_pad.append(wp.astype(jnp.bfloat16))
            self.b_pad.append(bp)
            cin_p = cout_p

    def __call__(self, xyz, points):
        S, K = self.npoint, self.nsample
        B, N, _ = xyz.shape
        D = points.shape[-1]
        cin = 3 + D
        assert self.channels[0] == cin
        cin_pad = _round_up(cin, 128)
        clast = self.channels[-1]

        fps_idx = farthest_point_sample(xyz, S)                      # (B, S)
        new_xyz = index_points(xyz, fps_idx)                         # (B, S, 3)
        dists = square_distance(new_xyz, xyz)                        # (B, S, N)
        _, idx = lax.top_k(-dists, K)                                # knn indices (B, S, K)
        idx_t = jnp.transpose(idx, (0, 2, 1)).astype(jnp.int32)[..., None]  # (B, K, S, 1)

        feat = jnp.concatenate([xyz, points], axis=-1)               # (B, N, 3+D)
        feat_pad = jnp.pad(feat, ((0, 0), (0, 0), (0, cin_pad - cin)))

        # Layer-1 fusion: project the full point table once per batch (tiny),
        # and precompute the per-query correction  b1 - center @ W1  (centers
        # only touch the first 3 (xyz) input channels).
        w1 = self.w_pad[0]
        feat_proj = jnp.einsum('bnc,cd->bnd', feat_pad.astype(jnp.bfloat16), w1,
                               preferred_element_type=jnp.float32).astype(jnp.bfloat16)
        ctr_w1 = jnp.einsum('bsc,cd->bsd', new_xyz, w1[:3].astype(jnp.float32),
                            precision=jax.lax.Precision.HIGHEST)
        corr = self.b_pad[0] - ctr_w1                                # (B, S, C1p) f32

        out_pad = sa_mlp_pallas(idx_t, feat_proj, corr,
                                self.w_pad[1:], self.b_pad[1:])
        return new_xyz, out_pad[..., :clast]


# ----------------------------------------------------------------------------
# Pure-JAX reference (module semantics: gather -> center -> bf16 MLP -> max)
# ----------------------------------------------------------------------------
def _reference_forward(xyz, points, module):
    S, K = module.npoint, module.nsample
    fps_idx = farthest_point_sample(xyz, S)
    new_xyz = index_points(xyz, fps_idx)
    _, idx = lax.top_k(-square_distance(new_xyz, xyz), K)
    grouped_xyz = index_points(xyz, idx) - new_xyz[:, :, None, :]
    grouped_pts = index_points(points, idx)
    h = jnp.concatenate([grouped_xyz, grouped_pts], axis=-1)         # (B,S,K,3+D)
    for w, b in zip(module.weights, module.biases):
        h = jnp.einsum('bskc,cd->bskd', h.astype(jnp.bfloat16),
                       w.astype(jnp.bfloat16),
                       preferred_element_type=jnp.float32)
        h = jnp.maximum(h + b[None, None], 0.0)
    return new_xyz, jnp.max(h, axis=2)


if __name__ == "__main__":
    key = jax.random.PRNGKey(0)
    k_xyz, k_pts, k_par = jax.random.split(key, 3)

    B, N, D = 2, 16, 5
    npoint, nneighbor = 8, 4
    channels = [3 + D, 16, 32]                    # channels[0] must be 3 + feat dim

    xyz = jax.random.normal(k_xyz, (B, N, 3), jnp.float32)
    points = jax.random.normal(k_pts, (B, N, D), jnp.float32)

    module = TransitionDownPallas(npoint, nneighbor, channels, k_par)
    new_xyz, new_points = module(xyz, points)
    new_xyz = jax.block_until_ready(new_xyz)
    new_points = jax.block_until_ready(new_points)

    ref_xyz, ref_points = _reference_forward(xyz, points, module)

    assert new_xyz.shape == (B, npoint, 3)
    assert new_points.shape == (B, npoint, channels[-1])
    assert jnp.allclose(new_xyz, ref_xyz, atol=1e-5, rtol=1e-5)
    # bf16 MXU inputs + the gather/layer-1 reassociation -> bf16-level tolerance.
    assert jnp.allclose(new_points, ref_points, atol=2e-2, rtol=2e-2)
    print("KERNEL_OK")
</pallas_src>

<mosaic_0001>
module attributes {stable_mosaic.version = 11 : i64} {
  func.func @kernel(%arg0: i32, %arg1: i32, %arg2: memref<1x4x8x1xi32, #tpu.memory_space<vmem>>, %arg3: memref<1x16x128xbf16, #tpu.memory_space<vmem>>, %arg4: memref<1x8x128xf32, #tpu.memory_space<vmem>>, %arg5: memref<128x128xbf16, #tpu.memory_space<vmem>>, %arg6: memref<1x128xf32, #tpu.memory_space<vmem>>, %arg7: memref<1x8x128xf32, #tpu.memory_space<vmem>>) attributes {dimension_semantics = [#tpu.dimension_semantics<parallel>, #tpu.dimension_semantics<parallel>], iteration_bounds = array<i64: 2, 1>, scalar_prefetch = 0 : i64, scratch_operands = 0 : i64, tpu.core_type = #tpu.core_type<tc>, window_params = [{transform_indices = @transform_0, window_bounds = array<i64: 1, 4, 8, 1>}, {transform_indices = @transform_1, window_bounds = array<i64: 1, 16, 128>}, {transform_indices = @transform_2, window_bounds = array<i64: 1, 8, 128>}, {pipeline_mode = #tpu.pipeline_mode<synchronous>, transform_indices = @transform_3, window_bounds = array<i64: 128, 128>}, {pipeline_mode = #tpu.pipeline_mode<synchronous>, transform_indices = @transform_4, window_bounds = array<i64: 1, 128>}, {transform_indices = @transform_5, window_bounds = array<i64: 1, 8, 128>}]} {
    %c0 = arith.constant 0 : index
    %c0_0 = arith.constant 0 : index
    %c0_1 = arith.constant 0 : index
    %c0_2 = arith.constant 0 : index
    %0 = vector.load %arg2[%c0, %c0_0, %c0_1, %c0_2] : memref<1x4x8x1xi32, #tpu.memory_space<vmem>>, vector<1x4x8x1xi32>
    %1 = vector.shape_cast %0 : vector<1x4x8x1xi32> to vector<4x8x1xi32>
    %c0_3 = arith.constant 0 : index
    %c0_4 = arith.constant 0 : index
    %c0_5 = arith.constant 0 : index
    %2 = vector.load %arg3[%c0_3, %c0_4, %c0_5] : memref<1x16x128xbf16, #tpu.memory_space<vmem>>, vector<1x16x128xbf16>
    %3 = vector.shape_cast %2 : vector<1x16x128xbf16> to vector<16x128xbf16>
    %c0_6 = arith.constant 0 : index
    %c0_7 = arith.constant 0 : index
    %c0_8 = arith.constant 0 : index
    %4 = vector.load %arg4[%c0_6, %c0_7, %c0_8] : memref<1x8x128xf32, #tpu.memory_space<vmem>>, vector<1x8x128xf32>
    %5 = vector.shape_cast %4 : vector<1x8x128xf32> to vector<8x128xf32>
    %6 = tpu.iota {dimensions = array<i32: 2>} : vector<4x8x16xi32>
    %7 = vector.broadcast %1 : vector<4x8x1xi32> to vector<4x8x16xi32>
    %8 = arith.cmpi eq, %7, %6 : vector<4x8x16xi32>
    %9 = arith.extui %8 : vector<4x8x16xi1> to vector<4x8x16xi32>
    %10 = arith.sitofp %9 : vector<4x8x16xi32> to vector<4x8x16xf32>
    %11 = arith.truncf %10 : vector<4x8x16xf32> to vector<4x8x16xbf16>
    %12 = vector.shape_cast %11 : vector<4x8x16xbf16> to vector<32x16xbf16>
    %cst = arith.constant dense<0.000000e+00> : vector<32x128xf32>
    %13 = tpu.matmul %12, %3, %cst {dimension_numbers = #tpu.dot_dimension_numbers<[1], [0], [0], [1], [0, 0, 1, 1], [], []>} : vector<32x16xbf16>, vector<16x128xbf16>, vector<32x128xf32> -> vector<32x128xf32>
    %14 = vector.shape_cast %13 : vector<32x128xf32> to vector<4x8x128xf32>
    %15 = vector.shape_cast %5 : vector<8x128xf32> to vector<1x8x128xf32>
    %16 = vector.broadcast %15 : vector<1x8x128xf32> to vector<4x8x128xf32>
    %17 = arith.addf %14, %16 : vector<4x8x128xf32>
    %cst_9 = arith.constant 0.000000e+00 : f32
    %18 = vector.broadcast %cst_9 : f32 to vector<4x8x128xf32>
    %19 = arith.maximumf %17, %18 : vector<4x8x128xf32>
    %20 = vector.shape_cast %19 : vector<4x8x128xf32> to vector<32x128xf32>
    %21 = arith.truncf %20 : vector<32x128xf32> to vector<32x128xbf16>
    %c0_10 = arith.constant 0 : index
    %c0_11 = arith.constant 0 : index
    %22 = vector.load %arg5[%c0_10, %c0_11] : memref<128x128xbf16, #tpu.memory_space<vmem>>, vector<128x128xbf16>
    %cst_12 = arith.constant dense<0.000000e+00> : vector<32x128xf32>
    %23 = tpu.matmul %21, %22, %cst_12 {dimension_numbers = #tpu.dot_dimension_numbers<[1], [0], [0], [1], [0, 0, 1, 1], [], []>} : vector<32x128xbf16>, vector<128x128xbf16>, vector<32x128xf32> -> vector<32x128xf32>
    %c0_13 = arith.constant 0 : index
    %c0_14 = arith.constant 0 : index
    %24 = vector.load %arg6[%c0_13, %c0_14] : memref<1x128xf32, #tpu.memory_space<vmem>>, vector<1x128xf32>
    %25 = vector.broadcast %24 : vector<1x128xf32> to vector<32x128xf32>
    %26 = arith.addf %23, %25 : vector<32x128xf32>
    %cst_15 = arith.constant 0.000000e+00 : f32
    %27 = vector.broadcast %cst_15 : f32 to vector<32x128xf32>
    %28 = arith.maximumf %26, %27 : vector<32x128xf32>
    %29 = vector.shape_cast %28 : vector<32x128xf32> to vector<4x8x128xf32>
    %cst_16 = arith.constant dense<0xFF800000> : vector<8x128xf32>
    %30 = vector.multi_reduction <maximumf>, %29, %cst_16 [0] : vector<4x8x128xf32> to vector<8x128xf32>
    %c0_17 = arith.constant 0 : index
    %c0_18 = arith.constant 0 : index
    %c0_19 = arith.constant 0 : index
    %31 = vector.load %arg7[%c0_17, %c0_18, %c0_19] : memref<1x8x128xf32, #tpu.memory_space<vmem>>, vector<1x8x128xf32>
    %32 = vector.shape_cast %31 : vector<1x8x128xf32> to vector<8x128xf32>
    %33 = vector.shape_cast %30 : vector<8x128xf32> to vector<1x8x128xf32>
    tpu.vector_store %arg7[%c0_17, %c0_18, %c0_19], %33 {strides = array<i32>} : memref<1x8x128xf32, #tpu.memory_space<vmem>>, vector<1x8x128xf32>,
    return
  }
  func.func @transform_0(%arg0: i32, %arg1: i32) -> (i32, i32, i32, i32) {
    %c0_i32 = arith.constant 0 : i32
    %c0_i32_0 = arith.constant 0 : i32
    %c0_i32_1 = arith.constant 0 : i32
    return %arg0, %c0_i32, %arg1, %c0_i32_0 : i32, i32, i32, i32
  }
  func.func @transform_1(%arg0: i32, %arg1: i32) -> (i32, i32, i32) {
    %c0_i32 = arith.constant 0 : i32
    %c0_i32_0 = arith.constant 0 : i32
    %c0_i32_1 = arith.constant 0 : i32
    return %arg0, %c0_i32, %c0_i32_0 : i32, i32, i32
  }
  func.func @transform_2(%arg0: i32, %arg1: i32) -> (i32, i32, i32) {
    %c0_i32 = arith.constant 0 : i32
    %c0_i32_0 = arith.constant 0 : i32
    return %arg0, %arg1, %c0_i32 : i32, i32, i32
  }
  func.func @transform_3(%arg0: i32, %arg1: i32) -> (i32, i32) {
    %c0_i32 = arith.constant 0 : i32
    %c0_i32_0 = arith.constant 0 : i32
    %c0_i32_1 = arith.constant 0 : i32
    return %c0_i32, %c0_i32_0 : i32, i32
  }
  func.func @transform_4(%arg0: i32, %arg1: i32) -> (i32, i32) {
    %c0_i32 = arith.constant 0 : i32
    %c0_i32_0 = arith.constant 0 : i32
    %c0_i32_1 = arith.constant 0 : i32
    return %c0_i32, %c0_i32_0 : i32, i32
  }
  func.func @transform_5(%arg0: i32, %arg1: i32) -> (i32, i32, i32) {
    %c0_i32 = arith.constant 0 : i32
    %c0_i32_0 = arith.constant 0 : i32
    return %arg0, %arg1, %c0_i32 : i32, i32, i32
  }
}

</mosaic_0001>

<bundles_post_ra>
// kernel: tpu_custom_call.1
= control target key start
LH: loop header
LB: loop body
LE: loop exit
PB: predicated region body
PF: predicated region fallthrough
CT: control target
= control target key end

     0   :  { %10 = vsyncpa [#allocation3], 0  ;;  %s1196_s0 = inlined_call_operand.vmem [shape: s32[2,4,8,1], index: 0, kind: input, shape index: {}]   ;;  %s1197_s1 = inlined_call_operand.vmem [shape: bf16[2,16,128], index: 1, kind: input, shape index: {}]   ;;  %s1198_s2 = inlined_call_operand.hbm [shape: f32[2,8,128], index: 2, kind: input, shape index: {}]   ;;  %s1199_s3 = inlined_call_operand.vmem [shape: bf16[128,128], index: 3, kind: input, shape index: {}]   ;;  %s1200_s4 = inlined_call_operand.vmem [shape: f32[1,128], index: 4, kind: input, shape index: {}]   ;;  %s1201_s5 = inlined_call_operand.hbm [shape: f32[2,8,128], index: 5, kind: output, shape index: {}]  }
   0x1   :  { %12 = vsyncpa [#allocation3 + $0x1], 0 }
   0x2   :  { %13 = vsyncpa [#allocation4], 0 }
   0x3   :  { %15 = vsyncpa [#allocation4 + $0x1], 0  ;;  %s982_s18 = smov 0   ;;  %s984_s19 = smov 0  }
   0x4   :  { %s986_s20 = smov 0   ;;  %s988_s21 = smov 0  }
   0x5   :  { %s990_s22 = smov 0   ;;  %s992_s23 = smov 0  }
   0x6 LB: > { %s681_s24 = sadd.s32 4294967295, %s946_s23   ;;  %s682_s25 = sadd.s32 4294967294, %s946_s23   ;;  %s946_s23 = sphi %s992_s23, %s21_s23   ;;  %s942_s22 = sphi %s990_s22, %s1217_s22   ;;  %s938_s21 = sphi %s988_s21, %s1216_s21   ;;  %s934_s20 = sphi %s986_s20, %s1215_s20   ;;  %s930_s19 = sphi %s984_s19, %s1214_s19   ;;  %s926_s18 = sphi %s982_s18, %s1213_s18  }
   0x7   : > { %s33_s26 = sadd.s32 1, %s942_s22  ;;  %s96_s27 = sadd.s32 1, %s934_s20 }
   0x8   : > { %p35_p0 = scmp.ge.s32.totalorder %s33_s26, 2  ;;  %p103_p1 = scmp.ne.s32.totalorder %s934_s20, %s930_s19 }
   0x9   : > { %p104_p2 = scmp.eq.s32.totalorder %s946_s23, 0  ;;  %p109_p3 = scmp.ne.s32.totalorder %s930_s19, %s926_s18 }
   0xa   : > { %s1219_s26 = smov (%p35_p0, %s33_s26), 0  ;;  %p110_p5 = scmp.eq.s32.totalorder %s681_s24, 0 }
   0xb   : > { %p1023_p4 = por %p104_p2, %p103_p1  ;;  %s91_s29 = ssub.s32 %s942_s22, %s1219_s26 }
   0xc   : > { %p177_p6 = scmp.eq.s32.totalorder %s681_s24, 1  ;;  %p94_p7 = scmp.eq.s32.totalorder %s91_s29, 0 }
   0xd   : > { %p1029_p8 = por %p110_p5, %p109_p3  ;;  %p183_p10 = scmp.eq.s32.totalorder %s682_s25, 1 }
   0xe   : > { %p1033_p9 = por %p177_p6, %p103_p1  ;;  %p771_p13 = scmp.lt.s32.totalorder %s946_s23, 2 }
   0xf   : > { %s1038_s7 = scalar_select %p94_p7, %s934_s20, %s96_s27  }
  0x10   : > { %s1205_s6 = scalar_select %p1033_p9, 1, 0 }
  0x11   : > { %p1040_p11 = por %p183_p10, %p109_p3  ;;  %s228_s9 = sand.u32 1, %s934_s20  }
  0x12   : > { %s685_s10 = sshll.u32 %s228_s9, 3  ;;  %s686_s11 = sshll.u32 %s942_s22, 7 }
  0x13   : > { %s1206_s8 = scalar_select %p1040_p11, 1, 0 }
  0x14   : > { %s1051_s14 = scalar_lea.hbm %s1198_s2, %s686_s11  ;;  %s232_s15 = scalar_lea.vmem [#allocation2], %s685_s10 }
  0x15   : > { %s240_s16 = sshll.u32 %s232_s15, 4  ;;  %p1057_p0 = pnand %p771_p13, %p1023_p4  ;;  %s1053_s16 = int_to_ptr.vmem [resolvable:$true] %s240_s16 }
  0x16   : > { %s229_s24 = scalar_lea.sflag [#allocation3], %s228_s9  ;;  %s834_s25 = scalar_lea.hbm %s1051_s14, 128 }
  0x17   : > { %p835_p3 = scmp.ne.s32.totalorder %s1051_s14, %s834_s25  ;;  %p836_p5 = pneg %p1057_p0 }
  0x18   : > { %s839_s28 = scalar_lea.hbm %s1198_s2, 256  ;;  %p840_p4 = scmp.lt.u32.totalorder %s1051_s14, %s1198_s2 }
  0x19   : > { %p837_p6 = pnand %p836_p5, %p835_p3  ;;  %p841_p10 = scmp.lt.u32.totalorder %s839_s28, %s834_s25 }
  0x1a   : > { %p843_p12 = scmp.lt.u32.totalorder %s834_s25, %s1051_s14 }
  0x1b   : > { %p838_p7 = pneg %p837_p6  ;;  %p842_p13 = por %p841_p10, %p840_p4 }
  0x1d   : > { %p844_p1 = por %p843_p12, %p842_p13 }
  0x1f   : > { %p845_p2 = pnand %p844_p1, %p838_p7 }
  0x21   : > { %848 = shalt.err (!%p845_p2)
}
  0x22   : > { %s849_s9 = scalar_lea.vmem %s1053_s16, 128  ;;  %s948_s12 = smov [#allocation2]  }
  0x23   : > { %p850_p3 = scmp.ne.s32.totalorder %s1053_s16, %s849_s9  ;;  %s854_s13 = sshll.u32 %s948_s12, 4  ;;  %s855_s13 = int_to_ptr.vmem [resolvable:$false] %s854_s13 }
  0x24   : > { %s856_s15 = scalar_lea.vmem %s855_s13, 256  ;;  %p857_p9 = scmp.lt.s32.totalorder %s1053_s16, %s855_s13 }
  0x25   : > { %p852_p6 = pnand %p850_p3, %p836_p5  ;;  %p858_p4 = scmp.lt.s32.totalorder %s856_s15, %s849_s9 }
  0x27   : > { %p853_p11 = pneg %p852_p6  ;;  %p859_p10 = por %p858_p4, %p857_p9 }
  0x29   : > { %p860_p12 = pnand %p859_p10, %p853_p11 }
  0x2b   : > { %863 = shalt.err (!%p860_p12)
}
  0x2c   : > { %766 = dma.hbm_to_vmem [thread:$0]  (!%p1057_p0), %s1051_s14, 128, %s1053_s16, %s229_s24  }
  0x2d   : > { %p1208_p1 = scmp.lt.s32.totalorder %s946_s23, 3  ;;  %p1209_p2 = scmp.ge.s32.totalorder %s946_s23, 1 }
  0x2f   : > { %p246_p5 = pnand %p1209_p2, %p1208_p1 }
  0x30   : > { %s1093_s25 = sand.u32 (!%p246_p5), 1, %s930_s19  }
  0x31   : > { %249 = sbr.rel (%p246_p5) target bundleno = 660 (0x294), region = 40  ;;  %s688_s27 = sshll.u32 (!%p246_p5), %s1093_s25, 3 }
  0x32   : > { %s252_s29 = scalar_lea.sflag (!%p246_p5), [#allocation3], %s1093_s25  ;;  %s1099_s17 = scalar_lea.vmem (!%p246_p5), [#allocation2], %s688_s27 }
  0x38   : > { %917 = dma.done.wait (%p1029_p8), %s252_s29, 128  }
  0x39   : > { %919 = vsyncadd (%p1029_p8), %s252_s29, 4294967168  ;;  %p295_p9 = scmp.lt.s32.totalorder %s938_s21, 1  ;;  %v949_v0 = vmov 0   ;;  %v826_v6 = vld [vmem:[%s1199_s3] sm:$0xff]   ;;  %v827_v7 = vld [vmem:[%s1199_s3 + $0x8] sm:$0xff]   ;;  %v316_v12 = vlaneseq  ;;  %vm362_vm4 = vcmask 130048  }
  0x3a   : > { %824 = vset.pattern.permute.xlu1 %v949_v0  ;;  %823 = vset.pattern.permute.xlu0 %v949_v0  ;;  %v828_v8 = vld [vmem:[%s1199_s3 + $0x10] sm:$0xff]   ;;  %v829_v9 = vld [vmem:[%s1199_s3 + $0x18] sm:$0xff]   ;;  %v830_v10 = vld [vmem:[%s1199_s3 + $0x20] sm:$0xff]   ;;  %v950_v18 = vmov 0.0   ;;  %s294_s28 = scalar_lea.vmem [#allocation5], %s688_s27  ;;  %p1210_p11 = scmp.ne.s32.totalorder %s1205_s6, 0 }
  0x3b   : > { %s296_s14 = scalar_select %p295_p9, %s938_s21, 1  ;;  %739 = vmatprep.subr.bf16.mxu1 %v826_v6  ;;  %v831_v11 = vld [vmem:[%s1199_s3 + $0x28] sm:$0xff]   ;;  %v317_v13 = vand.u32 127, %v316_v12  ;;  %v832_v25 = vld [vmem:[%s1199_s3 + $0x30] sm:$0xff]   ;;  %v833_v26 = vld [vmem:[%s1199_s3 + $0x38] sm:$0xff]  }
  0x3c   : > { %740 = vmatpush3.bf16.msra.mxu1 %v826_v6  ;;  %v315_v27 = vld [vmem:[%s1099_s17] sm:$0xff]  ;;  %s713_s17 = sshll.u32 %s938_s21, 7  ;;  %s951_s21 = smov [#allocation5]  }
  0x3d   : > { %s716_s16 = sshll.u32 %s296_s14, 5  ;;  %s717_s30 = sshll.u32 %s296_s14, 3  ;;  %741 = vmatprep.subr.bf16.mxu1 %v827_v7  ;;  %v703_v42 = vld [vmem:[%s1200_s4] ss:$0 sm:$0xff] }
  0x3e   : > { %s302_s10 = scalar_lea.vmem %s1196_s0, %s716_s16  ;;  %s307_s12 = scalar_lea.vmem %s1197_s1, %s717_s30 }
  0x3f   : > { %v311_v1 = vld [vmem:[%s302_s10 + $0x10] sm:$0xff]  ;;  %v309_v2 = vld [vmem:[%s302_s10] sm:$0xff]  ;;  %v312_v3 = vld [vmem:[%s302_s10 + $0x18] sm:$0xff]  ;;  %s1147_s9 = scalar_lea.hbm %s1201_s5, %s713_s17  ;;  %s868_s27 = sshll.u32 %s951_s21, 4  ;;  %s869_s27 = int_to_ptr.vmem [resolvable:$false] %s868_s27 }
  0x40   : > { %325 = vperm.xlu1 %824, %v311_v1   ;;  %319 = vperm.xlu0 %823, %v309_v2   ;;  %v310_v4 = vld [vmem:[%s302_s10 + $0x8] sm:$0xff]  ;;  %v825_v5 = vld [vmem:[%s307_s12] sm:$0xff]   ;;  %s571_s10 = sshll.u32 %s294_s28, 4  ;;  %s557_s12 = scalar_lea.sflag [#allocation4], %s1093_s25  ;;  %s1149_s10 = int_to_ptr.vmem [resolvable:$true] %s571_s10 }
  0x41   : > { %733 = vmatprep.subr.bf16.mxu0 %v825_v5  ;;  %742 = vmatpush3.bf16.msra.mxu1 %v827_v7  ;;  %s864_s13 = scalar_lea.vmem %s1149_s10, 128  ;;  %s870_s15 = scalar_lea.vmem %s869_s27, 256 }
  0x42   : > { %734 = vmatpush3.bf16.msra.mxu0 %v825_v5  ;;  %743 = vmatprep.subr.bf16.mxu1 %v828_v8  ;;  %p865_p8 = scmp.ne.s32.totalorder %s1149_s10, %s864_s13  ;;  %p871_p13 = scmp.lt.s32.totalorder %s1149_s10, %s869_s27 }
  0x43   : > { %p872_p3 = scmp.lt.s32.totalorder %s870_s15, %s864_s13 }
  0x44   : > { %328 = vperm.xlu1 %824, %v312_v3   ;;  %322 = vperm.xlu0 %823, %v310_v4   ;;  %p866_p0 = pnand %p865_p8, %p1210_p11 }
  0x45   : > { %744 = vmatpush3.bf16.msra.mxu1 %v828_v8  ;;  %p873_p6 = por %p872_p3, %p871_p13 }
  0x46   : > { %745 = vmatprep.subr.bf16.mxu1 %v829_v9  ;;  %p867_p7 = pneg %p866_p0 }
  0x48   : > { %p874_p4 = pnand %p873_p6, %p867_p7 }
  0x49   : > { %746 = vmatpush3.bf16.msra.mxu1 %v829_v9 }
  0x4a   : > { %747 = vmatprep.subr.bf16.mxu1 %v830_v10 }
  0x4d   : > { %748 = vmatpush3.bf16.msra.mxu1 %v830_v10 }
  0x4e   : > { %749 = vmatprep.subr.bf16.mxu1 %v831_v11 }
  0x51   : > { %750 = vmatpush3.bf16.msra.mxu1 %v831_v11 }
  0x52   : > { %751 = vmatprep.subr.bf16.mxu1 %v832_v25 }
  0x55   : > { %752 = vmatpush3.bf16.msra.mxu1 %v832_v25 }
  0x56   : > { %753 = vmatprep.subr.bf16.mxu1 %v833_v26 }
  0x59   : > { %754 = vmatpush3.bf16.msra.mxu1 %v833_v26 }
  0xbf   : > { %v326_v14 = vpop.permute.xlu1 %325  ;;  %v320_v15 = vpop.permute.xlu0 %319 }
  0xc0   : > { %vm332_vm0 = vcmp.eq.s32.totalorder %v326_v14, %v317_v13  ;;  %vm330_vm1 = vcmp.eq.s32.totalorder %v320_v15, %v317_v13 }
  0xc1   : > { %v696_v19 = vsel %vm332_vm0, 1.0, %v950_v18  ;;  %v694_v20 = vsel %vm330_vm1, 1.0, %v950_v18 }
  0xc3   : > { %v329_v16 = vpop.permute.xlu1 %328  ;;  %v323_v17 = vpop.permute.xlu0 %322 }
  0xc4   : > { %vm333_vm2 = vcmp.eq.s32.totalorder %v329_v16, %v317_v13  ;;  %vm331_vm3 = vcmp.eq.s32.totalorder %v323_v17, %v317_v13 }
  0xc5   : > { %v697_v21 = vsel %vm333_vm2, 1.0, %v950_v18  ;;  %v695_v22 = vsel %vm331_vm3, 1.0, %v950_v18 }
  0xc6   : > { %v719_v23 = vpack.c.bf16 %v697_v21, %v696_v19  ;;  %v718_v24 = vpack.c.bf16 %v695_v22, %v694_v20 }
  0xc8   : > { %735 = vmatprep.mubr.msk.bf16.mxu0 %vm362_vm4, %v718_v24 }
  0xc9   : > { %736 = vmatmul.mubr.msk.bf16.vlgmr.msra.gmra.mrb[0].mxu0 %vm362_vm4, %v719_v23 }
 0x19c   : > { %v737_v28 = vpop.f32.mrb[0].mxu0 }
 0x19d   : > { %v420_v29 = vadd.f32 %v737_v28, %v315_v27  ;;  %v403_v30 = vpop.f32.mrb[1].mxu0 }
 0x19e   : > { %v418_v31 = vadd.f32 %v403_v30, %v315_v27  ;;  %v738_v32 = vpop.f32.mrb[2].mxu0 }
 0x19f   : > { %v421_v33 = vadd.f32 %v738_v32, %v315_v27  ;;  %v406_v34 = vpop.f32.mrb[3].mxu0  ;;  %v424_v36 = vmax.f32 %v420_v29, 0.0 }
 0x1a0   : > { %v419_v35 = vadd.f32 %v406_v34, %v315_v27  ;;  %v422_v38 = vmax.f32 %v418_v31, 0.0 }
 0x1a1   : > { %v425_v37 = vmax.f32 %v421_v33, 0.0 }
 0x1a2   : > { %v423_v39 = vmax.f32 %v419_v35, 0.0 }
 0x1a3   : > { %v427_v40 = vpack.c.bf16 %v425_v37, %v424_v36 }
 0x1a4   : > { %v426_v41 = vpack.c.bf16 %v423_v39, %v422_v38 }
 0x1a6   : > { %755 = vmatprep.mubr.bf16.mxu1 %v426_v41 }
 0x1a7   : > { %756 = vmatmul.mubr.bf16.vlgmr.msra.gmra.mrb[0].mxu1 %v427_v40 }
 0x27a   : > { %v757_v43 = vpop.f32.mrb[0].mxu1 }
 0x27b   : > { %v542_v44 = vadd.f32 %v757_v43, %v703_v42  ;;  %v533_v45 = vpop.f32.mrb[1].mxu1 }
 0x27c   : > { %v534_v46 = vadd.f32 %v703_v42, %v533_v45  ;;  %v758_v47 = vpop.f32.mrb[2].mxu1 }
 0x27d   : > { %v545_v48 = vadd.f32 %v758_v47, %v703_v42  ;;  %v536_v49 = vpop.f32.mrb[3].mxu1  ;;  %v550_v51 = vmax.f32 %v542_v44, 0.0 }
 0x27e   : > { %v537_v50 = vadd.f32 %v703_v42, %v536_v49  ;;  %v548_v53 = vmax.f32 %v534_v46, 0.0 }
 0x27f   : > { %v551_v52 = vmax.f32 %v545_v48, 0.0 }
 0x280   : > { %v549_v54 = vmax.f32 %v537_v50, 0.0 }
 0x281   : > { %v553_v55 = vmax.f32 %v550_v51, %v551_v52 }
 0x282   : > { %v552_v56 = vmax.f32 %v548_v53, %v549_v54 }
 0x284   : > { %v554_v57 = vmax.f32 %v552_v56, %v553_v55 }
 0x286   : > { %555 = vst [vmem:[%s294_s28] sm:$0xff] %v554_v57 }
 0x287   : > { %877 = shalt.err (!%p874_p4)
}
 0x288   : > { %s878_s25 = scalar_lea.hbm %s1147_s9, 128  ;;  %s882_s14 = scalar_lea.hbm %s1201_s5, 256 }
 0x289   : > { %p879_p10 = scmp.ne.s32.totalorder %s1147_s9, %s878_s25  ;;  %p883_p2 = scmp.lt.u32.totalorder %s1147_s9, %s1201_s5 }
 0x28a   : > { %p884_p5 = scmp.lt.u32.totalorder %s882_s14, %s878_s25  ;;  %p886_p8 = scmp.lt.u32.totalorder %s878_s25, %s1147_s9 }
 0x28b   : > { %p880_p12 = pnand %p879_p10, %p1210_p11 }
 0x28c   : > { %p885_p9 = por %p884_p5, %p883_p2 }
 0x28d   : > { %p881_p1 = pneg %p880_p12 }
 0x28e   : > { %p887_p0 = por %p886_p8, %p885_p9 }
 0x290   : > { %p888_p7 = pnand %p887_p0, %p881_p1 }
 0x292   : > { %891 = shalt.err (!%p888_p7)
}
 0x293   : > { %761 = dma.vmem_to_hbm [thread:$0]  (%p1210_p11), %s1149_s10, 128, %s1147_s9, %s557_s12  }
 0x294 PF: > { %s583_s28 = sand.u32 1, %s926_s18   ;;  %p1211_p13 = scmp.ne.s32.totalorder %s1206_s8, 0 }
 0x295   : > { %p1212_p3 = scmp.ge.s32.totalorder %s946_s23, 2  ;;  %s584_s30 = scalar_lea.sflag [#allocation4], %s583_s28 }
 0x297   : > { %p768_p6 = pnand %p1212_p3, %p1211_p13 }
 0x299   : > { %921 = dma.done.wait (!%p768_p6), %s584_s30, 128  }
 0x29a   : > { %923 = vsyncadd (!%p768_p6), %s584_s30, 4294967168  ;;  %s21_s23 = sadd.s32 1, %s946_s23   ;;  %s1213_s18 = smov %s930_s19 }
 0x29b   : > { %p18_p4 = scmp.ge.s32.totalorder %s21_s23, 4   ;;  %s1214_s19 = smov %s934_s20 }
 0x29c   : > { %s1215_s20 = smov %s1038_s7  ;;  %s1216_s21 = smov %s942_s22 }
 0x29d   : > { %s1217_s22 = smov %s1219_s26  ;;  %20 = sbr.rel (!%p18_p4) target bundleno = 6 (0x6), region = 91 }
 0x2a4   :  { %589 = vsyncpa [#allocation3], 1 }
 0x2a5   :  { %591 = vsyncpa [#allocation3 + $0x1], 1 }
 0x2a6   :  { %592 = vsyncpa [#allocation4], 1 }
 0x2a7   :  { %594 = vsyncpa [#allocation4 + $0x1], 1 }

</bundles_post_ra>
